<compile_context>
chip_gen: v7x
topology: tpu7x:2x2x1
jax: 0.10.0
libtpu: 0.0.40
codegen_flags: <defaults>
</compile_context>

<pallas_src>
import jax
import jax.numpy as jnp
from jax.experimental import pallas as pl
from jax.experimental.pallas import tpu as pltpu


# ----------------------------------------------------------------------------
# Kernel 1: global avg/max pooling over HW (lane-axis reduction, HW-tiled).
# ----------------------------------------------------------------------------
def pool_kernel(x_ref, sum_ref, max_ref, sum_acc, max_acc):
    t = pl.program_id(1)

    @pl.when(t == 0)
    def _init():
        sum_acc[...] = jnp.zeros_like(sum_acc)
        max_acc[...] = jnp.full_like(max_acc, -jnp.inf)

    xv = x_ref[0]                                                    # (C, THW), input dtype
    sum_acc[...] += jnp.sum(xv, axis=1, keepdims=True, dtype=jnp.float32)
    max_acc[...] = jnp.maximum(
        max_acc[...], jnp.max(xv, axis=1, keepdims=True).astype(jnp.float32))

    @pl.when(t == pl.num_programs(1) - 1)
    def _flush():
        sum_ref[0] = sum_acc[...]
        max_ref[0] = max_acc[...]


# ----------------------------------------------------------------------------
# Kernel 2: tiny shared MLP, batched over B and {avg, max} (runs once).
# ----------------------------------------------------------------------------
def mlp_kernel(pooled_ref, w1t_ref, w2t_ref, attn_ref):
    p = pooled_ref[...]                                              # (2B, C) f32
    h = jnp.maximum(
        jnp.dot(p, w1t_ref[...], preferred_element_type=jnp.float32), 0.0)   # (2B, hidden)
    o = jnp.dot(h, w2t_ref[...], preferred_element_type=jnp.float32)         # (2B, C)
    nb = attn_ref.shape[0]
    attn_ref[...] = jax.nn.sigmoid(o[:nb, :] + o[nb:, :]).astype(attn_ref.dtype)


# ----------------------------------------------------------------------------
# Kernel 3: per-(b, c) scale, broadcast across HW lanes (HW-tiled).
# ----------------------------------------------------------------------------
def scale_kernel(x_ref, attn_ref, y_ref):
    y_ref[0] = (x_ref[0] * attn_ref[0]).astype(y_ref.dtype)          # (C,THW)*(C,1)


def _pick_hw_tile(hw, c, itemsize, budget_bytes=4 * 1024 * 1024):
    """Largest HW tile that divides HW, is lane-aligned (mult of 128) and fits budget."""
    max_cols = max(budget_bytes // max(c * itemsize, 1), 128)
    if hw <= max_cols:
        return hw
    t = (max_cols // 128) * 128
    while t >= 128:
        if hw % t == 0:
            return t
        t -= 128
    # TODO(synk): HW with no 128-multiple divisor falls back to one full-HW block.
    return hw


def channel_attention(x, w1, w2):
    """x: (B, C, H, W) NCHW.  w1: (hidden, C) first 1x1 conv weight.  w2: (C, hidden)."""
    B, C, H, W = x.shape
    hidden = w1.shape[0]
    HW = H * W
    itemsize = jnp.dtype(x.dtype).itemsize

    x_r = x.reshape(B, C, HW)                 # free reshape of NCHW (no transpose)
    thw = _pick_hw_tile(HW, C, itemsize)
    num_t = HW // thw

    # ---- pooling kernel --------------------------------------------------
    sum_p, max_p = pl.pallas_call(
        pool_kernel,
        out_shape=(
            jax.ShapeDtypeStruct((B, C, 1), jnp.float32),
            jax.ShapeDtypeStruct((B, C, 1), jnp.float32),
        ),
        grid_spec=pltpu.PrefetchScalarGridSpec(
            num_scalar_prefetch=0,
            grid=(B, num_t),
            in_specs=[pl.BlockSpec((1, C, thw), lambda b, t: (b, 0, t))],
            out_specs=[
                pl.BlockSpec((1, C, 1), lambda b, t: (b, 0, 0)),
                pl.BlockSpec((1, C, 1), lambda b, t: (b, 0, 0)),
            ],
            scratch_shapes=[
                pltpu.VMEM((C, 1), jnp.float32),
                pltpu.VMEM((C, 1), jnp.float32),
            ],
        ),
        compiler_params=pltpu.CompilerParams(
            dimension_semantics=("parallel", "arbitrary")),
        cost_estimate=pl.CostEstimate(
            flops=2 * B * HW * C,
            transcendentals=0,
            bytes_accessed=B * HW * C * itemsize + 2 * B * C * 4),
    )(x_r)

    # ---- tiny shared MLP (single kernel invocation for the whole batch) ---
    avg = sum_p[..., 0] * (1.0 / HW)                         # (B, C) f32
    mx = max_p[..., 0]                                       # (B, C) f32
    pooled = jnp.concatenate([avg, mx], axis=0)              # (2B, C) f32
    w1t = jnp.transpose(w1).astype(jnp.float32)              # (C, hidden)
    w2t = jnp.transpose(w2).astype(jnp.float32)              # (hidden, C)

    attn2d = pl.pallas_call(
        mlp_kernel,
        out_shape=jax.ShapeDtypeStruct((B, C), x.dtype),
    )(pooled, w1t, w2t)

    # ---- scale kernel ------------------------------------------------------
    attn_bc1 = attn2d.reshape(B, C, 1)
    y_r = pl.pallas_call(
        scale_kernel,
        out_shape=jax.ShapeDtypeStruct((B, C, HW), x.dtype),
        grid_spec=pltpu.PrefetchScalarGridSpec(
            num_scalar_prefetch=0,
            grid=(B, num_t),
            in_specs=[
                pl.BlockSpec((1, C, thw), lambda b, t: (b, 0, t)),
                pl.BlockSpec((1, C, 1), lambda b, t: (b, 0, 0)),
            ],
            out_specs=pl.BlockSpec((1, C, thw), lambda b, t: (b, 0, t)),
        ),
        compiler_params=pltpu.CompilerParams(
            dimension_semantics=("parallel", "parallel")),
        cost_estimate=pl.CostEstimate(
            flops=B * HW * C,
            transcendentals=0,
            bytes_accessed=2 * B * HW * C * itemsize + B * C * itemsize),
    )(x_r, attn_bc1)

    y = y_r.reshape(B, C, H, W)
    attn = attn2d.reshape(B, C, 1, 1)
    return y, attn


def channel_attention_ref(x, w1, w2):
    """Pure-JAX reference of the PyTorch forward pass."""
    avg = jnp.mean(x, axis=(2, 3))                           # (B, C)
    mx = jnp.max(x, axis=(2, 3))                             # (B, C)

    def fc(v):
        h = jnp.maximum(v @ w1.T, 0.0)
        return h @ w2.T

    attn = jax.nn.sigmoid(fc(avg) + fc(mx))                  # (B, C)
    attn = attn[:, :, None, None]                            # (B, C, 1, 1)
    return x * attn, attn


if __name__ == "__main__":
    # Module config: in_channels=4, ratio=16 -> ratio clamps to 4 -> hidden = 4 // 4 = 1
    B, C, H, W = 2, 4, 16, 16
    ratio = 16
    if C < ratio:
        ratio = C
    hidden = C // ratio

    key = jax.random.PRNGKey(0)
    kx, k1, k2 = jax.random.split(key, 3)
    x = jax.random.normal(kx, (B, C, H, W), dtype=jnp.float32)
    # Conv2d(C, hidden, 1, bias=False) weight -> (hidden, C); Conv2d(hidden, C, 1) -> (C, hidden)
    w1 = jax.random.normal(k1, (hidden, C), dtype=jnp.float32) * 0.5
    w2 = jax.random.normal(k2, (C, hidden), dtype=jnp.float32) * 0.5

    y, attn = jax.jit(channel_attention)(x, w1, w2)
    y = jax.block_until_ready(y)
    attn = jax.block_until_ready(attn)

    y_ref, attn_ref = channel_attention_ref(x, w1, w2)
    assert y.shape == (B, C, H, W) and attn.shape == (B, C, 1, 1)
    assert jnp.allclose(y, y_ref, atol=1e-5, rtol=1e-5)
    assert jnp.allclose(attn, attn_ref, atol=1e-5, rtol=1e-5)

    print("KERNEL_OK")
</pallas_src>

<mosaic_0001>
module attributes {stable_mosaic.version = 11 : i64} {
  func.func @pool_kernel(%arg0: i32, %arg1: i32, %arg2: memref<1x4x256xf32, #tpu.memory_space<vmem>>, %arg3: memref<1x4x1xf32, #tpu.memory_space<vmem>>, %arg4: memref<1x4x1xf32, #tpu.memory_space<vmem>>, %arg5: memref<4x1xf32, #tpu.memory_space<vmem>>, %arg6: memref<4x1xf32, #tpu.memory_space<vmem>>) attributes {dimension_semantics = [#tpu.dimension_semantics<parallel>, #tpu.dimension_semantics<arbitrary>], iteration_bounds = array<i64: 2, 1>, scalar_prefetch = 0 : i64, scratch_operands = 2 : i64, tpu.core_type = #tpu.core_type<tc>, window_params = [{transform_indices = @transform_0, window_bounds = array<i64: 1, 4, 256>}, {transform_indices = @transform_1, window_bounds = array<i64: 1, 4, 1>}, {transform_indices = @transform_2, window_bounds = array<i64: 1, 4, 1>}]} {
    %c0_i32 = arith.constant 0 : i32
    %0 = arith.cmpi eq, %arg1, %c0_i32 : i32
    %1 = arith.extui %0 : i1 to i32
    %c0_i32_0 = arith.constant 0 : i32
    %2 = arith.cmpi ne, %1, %c0_i32_0 : i32
    scf.if %2 {
      %cst_14 = arith.constant 0.000000e+00 : f32
      %18 = vector.broadcast %cst_14 : f32 to vector<4x1xf32>
      %c0_15 = arith.constant 0 : index
      %c0_16 = arith.constant 0 : index
      %19 = vector.load %arg5[%c0_15, %c0_16] : memref<4x1xf32, #tpu.memory_space<vmem>>, vector<4x1xf32>
      tpu.vector_store %arg5[%c0_15, %c0_16], %18 {strides = array<i32>} : memref<4x1xf32, #tpu.memory_space<vmem>>, vector<4x1xf32>,
      %cst_17 = arith.constant 0xFF800000 : f32
      %20 = vector.broadcast %cst_17 : f32 to vector<4x1xf32>
      %c0_18 = arith.constant 0 : index
      %c0_19 = arith.constant 0 : index
      %21 = vector.load %arg6[%c0_18, %c0_19] : memref<4x1xf32, #tpu.memory_space<vmem>>, vector<4x1xf32>
      tpu.vector_store %arg6[%c0_18, %c0_19], %20 {strides = array<i32>} : memref<4x1xf32, #tpu.memory_space<vmem>>, vector<4x1xf32>,
    } else {
    }
    %c0 = arith.constant 0 : index
    %c0_1 = arith.constant 0 : index
    %c0_2 = arith.constant 0 : index
    %3 = vector.load %arg2[%c0, %c0_1, %c0_2] : memref<1x4x256xf32, #tpu.memory_space<vmem>>, vector<1x4x256xf32>
    %4 = vector.shape_cast %3 : vector<1x4x256xf32> to vector<4x256xf32>
    %c0_3 = arith.constant 0 : index
    %c0_4 = arith.constant 0 : index
    %5 = vector.load %arg5[%c0_3, %c0_4] : memref<4x1xf32, #tpu.memory_space<vmem>>, vector<4x1xf32>
    %cst = arith.constant dense<0.000000e+00> : vector<4xf32>
    %6 = vector.multi_reduction <add>, %4, %cst [1] : vector<4x256xf32> to vector<4xf32>
    %7 = vector.shape_cast %6 : vector<4xf32> to vector<4x1xf32>
    %8 = arith.addf %5, %7 : vector<4x1xf32>
    %c0_5 = arith.constant 0 : index
    %c0_6 = arith.constant 0 : index
    %9 = vector.load %arg5[%c0_5, %c0_6] : memref<4x1xf32, #tpu.memory_space<vmem>>, vector<4x1xf32>
    tpu.vector_store %arg5[%c0_5, %c0_6], %8 {strides = array<i32>} : memref<4x1xf32, #tpu.memory_space<vmem>>, vector<4x1xf32>,
    %c0_7 = arith.constant 0 : index
    %c0_8 = arith.constant 0 : index
    %10 = vector.load %arg6[%c0_7, %c0_8] : memref<4x1xf32, #tpu.memory_space<vmem>>, vector<4x1xf32>
    %cst_9 = arith.constant dense<0xFF800000> : vector<4xf32>
    %11 = vector.multi_reduction <maximumf>, %4, %cst_9 [1] : vector<4x256xf32> to vector<4xf32>
    %12 = vector.shape_cast %11 : vector<4xf32> to vector<4x1xf32>
    %13 = arith.maximumf %10, %12 : vector<4x1xf32>
    %c0_10 = arith.constant 0 : index
    %c0_11 = arith.constant 0 : index
    %14 = vector.load %arg6[%c0_10, %c0_11] : memref<4x1xf32, #tpu.memory_space<vmem>>, vector<4x1xf32>
    tpu.vector_store %arg6[%c0_10, %c0_11], %13 {strides = array<i32>} : memref<4x1xf32, #tpu.memory_space<vmem>>, vector<4x1xf32>,
    %c0_i32_12 = arith.constant 0 : i32
    %15 = arith.cmpi eq, %arg1, %c0_i32_12 : i32
    %16 = arith.extui %15 : i1 to i32
    %c0_i32_13 = arith.constant 0 : i32
    %17 = arith.cmpi ne, %16, %c0_i32_13 : i32
    scf.if %17 {
      %c0_14 = arith.constant 0 : index
      %c0_15 = arith.constant 0 : index
      %18 = vector.load %arg5[%c0_14, %c0_15] : memref<4x1xf32, #tpu.memory_space<vmem>>, vector<4x1xf32>
      %c0_16 = arith.constant 0 : index
      %c0_17 = arith.constant 0 : index
      %c0_18 = arith.constant 0 : index
      %19 = vector.load %arg3[%c0_16, %c0_17, %c0_18] : memref<1x4x1xf32, #tpu.memory_space<vmem>>, vector<1x4x1xf32>
      %20 = vector.shape_cast %19 : vector<1x4x1xf32> to vector<4x1xf32>
      %21 = vector.shape_cast %18 : vector<4x1xf32> to vector<1x4x1xf32>
      tpu.vector_store %arg3[%c0_16, %c0_17, %c0_18], %21 {strides = array<i32>} : memref<1x4x1xf32, #tpu.memory_space<vmem>>, vector<1x4x1xf32>,
      %c0_19 = arith.constant 0 : index
      %c0_20 = arith.constant 0 : index
      %22 = vector.load %arg6[%c0_19, %c0_20] : memref<4x1xf32, #tpu.memory_space<vmem>>, vector<4x1xf32>
      %c0_21 = arith.constant 0 : index
      %c0_22 = arith.constant 0 : index
      %c0_23 = arith.constant 0 : index
      %23 = vector.load %arg4[%c0_21, %c0_22, %c0_23] : memref<1x4x1xf32, #tpu.memory_space<vmem>>, vector<1x4x1xf32>
      %24 = vector.shape_cast %23 : vector<1x4x1xf32> to vector<4x1xf32>
      %25 = vector.shape_cast %22 : vector<4x1xf32> to vector<1x4x1xf32>
      tpu.vector_store %arg4[%c0_21, %c0_22, %c0_23], %25 {strides = array<i32>} : memref<1x4x1xf32, #tpu.memory_space<vmem>>, vector<1x4x1xf32>,
    } else {
    }
    return
  }
  func.func @transform_0(%arg0: i32, %arg1: i32) -> (i32, i32, i32) {
    %c0_i32 = arith.constant 0 : i32
    %c0_i32_0 = arith.constant 0 : i32
    return %arg0, %c0_i32, %arg1 : i32, i32, i32
  }
  func.func @transform_1(%arg0: i32, %arg1: i32) -> (i32, i32, i32) {
    %c0_i32 = arith.constant 0 : i32
    %c0_i32_0 = arith.constant 0 : i32
    %c0_i32_1 = arith.constant 0 : i32
    return %arg0, %c0_i32, %c0_i32_0 : i32, i32, i32
  }
  func.func @transform_2(%arg0: i32, %arg1: i32) -> (i32, i32, i32) {
    %c0_i32 = arith.constant 0 : i32
    %c0_i32_0 = arith.constant 0 : i32
    %c0_i32_1 = arith.constant 0 : i32
    return %arg0, %c0_i32, %c0_i32_0 : i32, i32, i32
  }
}

module attributes {stable_mosaic.version = 11 : i64} {
  func.func @mlp_kernel(%arg0: memref<4x4xf32, #tpu.memory_space<vmem>>, %arg1: memref<4x1xf32, #tpu.memory_space<vmem>>, %arg2: memref<1x4xf32, #tpu.memory_space<vmem>>, %arg3: memref<2x4xf32, #tpu.memory_space<vmem>>) attributes {dimension_semantics = [], scalar_prefetch = 0 : i64, scratch_operands = 0 : i64, tpu.core_type = #tpu.core_type<tc>} {
    %c0 = arith.constant 0 : index
    %c0_0 = arith.constant 0 : index
    %0 = vector.load %arg0[%c0, %c0_0] : memref<4x4xf32, #tpu.memory_space<vmem>>, vector<4x4xf32>
    %c0_1 = arith.constant 0 : index
    %c0_2 = arith.constant 0 : index
    %1 = vector.load %arg1[%c0_1, %c0_2] : memref<4x1xf32, #tpu.memory_space<vmem>>, vector<4x1xf32>
    %cst = arith.constant dense<0.000000e+00> : vector<4x1xf32>
    %2 = tpu.matmul %0, %1, %cst {dimension_numbers = #tpu.dot_dimension_numbers<[1], [0], [0], [1], [0, 0, 1, 1], [], []>} : vector<4x4xf32>, vector<4x1xf32>, vector<4x1xf32> -> vector<4x1xf32>
    %cst_3 = arith.constant 0.000000e+00 : f32
    %3 = vector.broadcast %cst_3 : f32 to vector<4x1xf32>
    %4 = arith.maximumf %2, %3 : vector<4x1xf32>
    %c0_4 = arith.constant 0 : index
    %c0_5 = arith.constant 0 : index
    %5 = vector.load %arg2[%c0_4, %c0_5] : memref<1x4xf32, #tpu.memory_space<vmem>>, vector<1x4xf32>
    %cst_6 = arith.constant dense<0.000000e+00> : vector<4x4xf32>
    %6 = tpu.matmul %4, %5, %cst_6 {dimension_numbers = #tpu.dot_dimension_numbers<[1], [0], [0], [1], [0, 0, 1, 1], [], []>} : vector<4x1xf32>, vector<1x4xf32>, vector<4x4xf32> -> vector<4x4xf32>
    %7 = vector.extract_strided_slice %6 {offsets = [0, 0], sizes = [2, 4], strides = [1, 1]} : vector<4x4xf32> to vector<2x4xf32>
    %8 = vector.extract_strided_slice %6 {offsets = [2, 0], sizes = [2, 4], strides = [1, 1]} : vector<4x4xf32> to vector<2x4xf32>
    %9 = arith.addf %7, %8 : vector<2x4xf32>
    %10 = arith.negf %9 : vector<2x4xf32>
    %11 = math.exp %10 : vector<2x4xf32>
    %cst_7 = arith.constant 1.000000e+00 : f32
    %12 = vector.broadcast %cst_7 : f32 to vector<2x4xf32>
    %13 = arith.addf %12, %11 : vector<2x4xf32>
    %14 = arith.divf %12, %13 : vector<2x4xf32>
    %c0_8 = arith.constant 0 : index
    %c0_9 = arith.constant 0 : index
    %15 = vector.load %arg3[%c0_8, %c0_9] : memref<2x4xf32, #tpu.memory_space<vmem>>, vector<2x4xf32>
    tpu.vector_store %arg3[%c0_8, %c0_9], %14 {strides = array<i32>} : memref<2x4xf32, #tpu.memory_space<vmem>>, vector<2x4xf32>,
    return
  }
}

module attributes {stable_mosaic.version = 11 : i64} {
  func.func @scale_kernel(%arg0: i32, %arg1: i32, %arg2: memref<1x4x256xf32, #tpu.memory_space<vmem>>, %arg3: memref<1x4x1xf32, #tpu.memory_space<vmem>>, %arg4: memref<1x4x256xf32, #tpu.memory_space<vmem>>) attributes {dimension_semantics = [#tpu.dimension_semantics<parallel>, #tpu.dimension_semantics<parallel>], iteration_bounds = array<i64: 2, 1>, scalar_prefetch = 0 : i64, scratch_operands = 0 : i64, tpu.core_type = #tpu.core_type<tc>, window_params = [{transform_indices = @transform_0, window_bounds = array<i64: 1, 4, 256>}, {transform_indices = @transform_1, window_bounds = array<i64: 1, 4, 1>}, {transform_indices = @transform_2, window_bounds = array<i64: 1, 4, 256>}]} {
    %c0 = arith.constant 0 : index
    %c0_0 = arith.constant 0 : index
    %c0_1 = arith.constant 0 : index
    %0 = vector.load %arg2[%c0, %c0_0, %c0_1] : memref<1x4x256xf32, #tpu.memory_space<vmem>>, vector<1x4x256xf32>
    %1 = vector.shape_cast %0 : vector<1x4x256xf32> to vector<4x256xf32>
    %c0_2 = arith.constant 0 : index
    %c0_3 = arith.constant 0 : index
    %c0_4 = arith.constant 0 : index
    %2 = vector.load %arg3[%c0_2, %c0_3, %c0_4] : memref<1x4x1xf32, #tpu.memory_space<vmem>>, vector<1x4x1xf32>
    %3 = vector.shape_cast %2 : vector<1x4x1xf32> to vector<4x1xf32>
    %4 = vector.broadcast %3 : vector<4x1xf32> to vector<4x256xf32>
    %5 = arith.mulf %1, %4 : vector<4x256xf32>
    %c0_5 = arith.constant 0 : index
    %c0_6 = arith.constant 0 : index
    %c0_7 = arith.constant 0 : index
    %6 = vector.load %arg4[%c0_5, %c0_6, %c0_7] : memref<1x4x256xf32, #tpu.memory_space<vmem>>, vector<1x4x256xf32>
    %7 = vector.shape_cast %6 : vector<1x4x256xf32> to vector<4x256xf32>
    %8 = vector.shape_cast %5 : vector<4x256xf32> to vector<1x4x256xf32>
    tpu.vector_store %arg4[%c0_5, %c0_6, %c0_7], %8 {strides = array<i32>} : memref<1x4x256xf32, #tpu.memory_space<vmem>>, vector<1x4x256xf32>,
    return
  }
  func.func @transform_0(%arg0: i32, %arg1: i32) -> (i32, i32, i32) {
    %c0_i32 = arith.constant 0 : i32
    %c0_i32_0 = arith.constant 0 : i32
    return %arg0, %c0_i32, %arg1 : i32, i32, i32
  }
  func.func @transform_1(%arg0: i32, %arg1: i32) -> (i32, i32, i32) {
    %c0_i32 = arith.constant 0 : i32
    %c0_i32_0 = arith.constant 0 : i32
    %c0_i32_1 = arith.constant 0 : i32
    return %arg0, %c0_i32, %c0_i32_0 : i32, i32, i32
  }
  func.func @transform_2(%arg0: i32, %arg1: i32) -> (i32, i32, i32) {
    %c0_i32 = arith.constant 0 : i32
    %c0_i32_0 = arith.constant 0 : i32
    return %arg0, %c0_i32, %arg1 : i32, i32, i32
  }
}

</mosaic_0001>

<bundles_post_ra>
// kernel: channel_attention.3
= control target key start
LH: loop header
LB: loop body
LE: loop exit
PB: predicated region body
PF: predicated region fallthrough
CT: control target
= control target key end

     0   :  { %s395_s9 = smov 0   ;;  %s397_s10 = smov 0   ;;  %s441_s0 = inlined_call_operand.vmem [shape: f32[2,4,256], index: 0, kind: input, shape index: {}]   ;;  %s442_s1 = inlined_call_operand.vmem [shape: f32[2,4,1], index: 1, kind: output, shape index: {0}]   ;;  %s443_s2 = inlined_call_operand.vmem [shape: f32[2,4,1], index: 2, kind: output, shape index: {1}]  }
   0x1   :  { %s399_s11 = smov 0  }
   0x2 LB: > { %s25_s12 = sadd.s32 1, %s372_s10  ;;  %p319_p0 = scmp.ge.s32.totalorder %s376_s11, 1  ;;  %s376_s11 = sphi %s399_s11, %s13_s11   ;;  %s372_s10 = sphi %s397_s10, %s445_s10   ;;  %s368_s9 = sphi %s395_s9, %s444_s9  }
   0x3   : > { %p27_p1 = scmp.ge.s32.totalorder %s25_s12, 2  ;;  %p134_p2 = scmp.lt.s32.totalorder %s376_s11, 3 }
   0x5   : > { %s447_s12 = smov (%p27_p1, %s25_s12), 0  ;;  %p135_p3 = pnand %p319_p0, %p134_p2 }
   0x6   : > { %p164_p4 = scmp.lt.s32.totalorder (!%p135_p3), %s368_s9, 1  ;;  %vm185_vm0 = vcmask (!%p135_p3), 3072   ;;  %v378_v0 = vmov (!%p135_p3), 0.0   ;;  %vm193_vm1 = vcmask (!%p135_p3), 1043456   ;;  %v379_v9 = vmov (!%p135_p3), -inf  }
   0x7   : > { %138 = sbr.rel (%p135_p3) target bundleno = 180 (0xb4), region = 24  ;;  %186 = vst.msk [vmem:[#allocation2] sm:$0xf] (!%p135_p3), %vm185_vm0, %v378_v0  ;;  %187 = vst.msk [vmem:[#allocation3] sm:$0xf] (!%p135_p3), %vm185_vm0, %v379_v9 }
   0xe   : > { %s449_s9 = smov (!%p164_p4, %s368_s9), 1  ;;  %v189_v10 = vld [vmem:[#allocation2] sm:$0xf]  ;;  %v202_v13 = vld [vmem:[#allocation3] sm:$0xf] }
   0xf   : > { %s326_s13 = sshll.u32 %s449_s9, 3  ;;  %s322_s17 = sshll.u32 %s449_s9, 2 }
  0x10   : > { %s171_s16 = scalar_lea.vmem %s441_s0, %s326_s13  ;;  %s176_s20 = scalar_lea.vmem %s442_s1, %s322_s17 }
  0x11   : > { %v188_v1 = vld [vmem:[%s171_s16] sm:$0xff]  ;;  %s180_s23 = scalar_lea.vmem %s443_s2, %s322_s17 }
  0x12   : > { %v191_v2 = vcombine.high %v188_v1, %v188_v1  ;;  %v194_v3 = vsel %vm193_vm1, %v188_v1, 0.0  ;;  %v203_v5 = vsel %vm193_vm1, %v188_v1, -inf }
  0x14   : > { %v195_v4 = vsel %vm193_vm1, %v191_v2, 0.0  ;;  %v204_v6 = vsel %vm193_vm1, %v191_v2, -inf }
  0x15   : > { %v196_v7 = vadd.f32 %v195_v4, %v194_v3  ;;  %v205_v8 = vmax.f32 %v203_v5, %v204_v6 }
  0x17   : > { %197 = vadd.xlane.f32.xlu0 %v196_v7 }
  0x1b   : > { %206 = vmax.xlane.f32.xlu0 %v205_v8 }
  0xa4   : > { %v198_v11 = vpop.xlane.xlu0 %197 }
  0xa5   : > { %v199_v12 = vadd.f32 %v198_v11, %v189_v10 }
  0xa7   : > { %201 = vst.msk [vmem:[#allocation2] sm:$0xf] %vm185_vm0, %v199_v12 }
  0xa8   : > { %v207_v14 = vpop.xlane.xlu0 %206 }
  0xa9   : > { %v208_v15 = vmax.f32 %v202_v13, %v207_v14 }
  0xab   : > { %209 = vst.msk [vmem:[#allocation3] sm:$0xf] %vm185_vm0, %v208_v15 }
  0xae   : > { %v213_v16 = vld [vmem:[#allocation2] sm:$0xf] }
  0xaf   : > { %214 = vst.msk [vmem:[%s176_s20] sm:$0xf] %vm185_vm0, %v213_v16 }
  0xb2   : > { %v215_v17 = vld [vmem:[#allocation3] sm:$0xf] }
  0xb3   : > { %216 = vst.msk [vmem:[%s180_s23] sm:$0xf] %vm185_vm0, %v215_v17 }
  0xb4 PF: > { %s13_s11 = sadd.s32 1, %s376_s11   ;;  %s444_s9 = smov %s372_s10 }
  0xb5   : > { %p10_p5 = scmp.ge.s32.totalorder %s13_s11, 4   ;;  %s445_s10 = smov %s447_s12 }
  0xb7   :  { %12 = sbr.rel (!%p10_p5) target bundleno = 2 (0x2), region = 74 }

// kernel: channel_attention.5
= control target key start
LH: loop header
LB: loop body
LE: loop exit
PB: predicated region body
PF: predicated region fallthrough
CT: control target
= control target key end

     0   :  { %s397_s9 = smov 0   ;;  %s399_s10 = smov 0   ;;  %s430_s0 = inlined_call_operand.vmem [shape: f32[2,4,256], index: 0, kind: input, shape index: {}]   ;;  %s431_s1 = inlined_call_operand.vmem [shape: f32[2,4,1], index: 1, kind: input, shape index: {}]   ;;  %s432_s2 = inlined_call_operand.vmem [shape: f32[2,4,256], index: 2, kind: output, shape index: {}]  }
   0x1   :  { %s401_s11 = smov 0  }
   0x2 LB: > { %s24_s12 = sadd.s32 1, %s374_s10  ;;  %p319_p0 = scmp.ge.s32.totalorder %s378_s11, 1  ;;  %s378_s11 = sphi %s401_s11, %s12_s11   ;;  %s374_s10 = sphi %s399_s10, %s434_s10   ;;  %s370_s9 = sphi %s397_s9, %s433_s9  }
   0x3   : > { %p26_p1 = scmp.ge.s32.totalorder %s24_s12, 2  ;;  %p142_p2 = scmp.lt.s32.totalorder %s378_s11, 3 }
   0x5   : > { %s436_s12 = smov (%p26_p1, %s24_s12), 0  ;;  %p143_p3 = pnand %p319_p0, %p142_p2 }
   0x6   : > { %p177_p4 = scmp.lt.s32.totalorder (!%p143_p3), %s370_s9, 1  ;;  %v380_v0 = vmov (!%p143_p3), 0   ;;  %v381_v2 = vmov (!%p143_p3), 839922192   ;;  %v209_v4 = vlaneseq (!%p143_p3) }
   0x7   : > { %146 = sbr.rel (%p143_p3) target bundleno = 151 (0x97), region = 28  ;;  %355 = vset.pattern.permute.xlu0 (!%p143_p3), %v380_v0  ;;  %v207_v3 = vunpack.c.l.s4 (!%p143_p3), %v381_v2 }
   0x8   : > { %v210_v6 = vshrl.u32 (!%p143_p3), %v209_v4, 7 }
   0x9   : > { %v208_v5 = vunpack.c.0.s8 (!%p143_p3), %v207_v3 }
   0xb   : > { %v211_v7 = vsub.s32 (!%p143_p3), %v208_v5, %v210_v6 }
   0xe   : > { %s438_s9 = smov (!%p177_p4, %s370_s9), 1 }
   0xf   : > { %s322_s13 = sshll.u32 %s438_s9, 2  ;;  %s327_s17 = sshll.u32 %s438_s9, 3 }
  0x10   : > { %s189_s16 = scalar_lea.vmem %s431_s1, %s322_s13  ;;  %s184_s20 = scalar_lea.vmem %s430_s0, %s327_s17 }
  0x11   : > { %v201_v1 = vld [vmem:[%s189_s16] sm:$0xf]  ;;  %s198_s23 = scalar_lea.vmem %s432_s2, %s327_s17 }
  0x12   : > { %204 = vperm.xlu0 %355, %v201_v1   ;;  %v200_v9 = vld [vmem:[%s184_s20] sm:$0xff] }
  0x91   : > { %v205_v8 = vpop.permute.xlu0 %204 }
  0x92   : > { %v212_v10 = vrot.slane %v205_v8, %v211_v7 }
  0x94   : > { %v214_v11 = vmul.f32 %v212_v10, %v200_v9 }
  0x96   : > { %215 = vst [vmem:[%s198_s23] sm:$0xff] %v214_v11 }
  0x97 PF: > { %s12_s11 = sadd.s32 1, %s378_s11   ;;  %s433_s9 = smov %s374_s10 }
  0x98   : > { %p9_p5 = scmp.ge.s32.totalorder %s12_s11, 4   ;;  %s434_s10 = smov %s436_s12 }
  0x9a   :  { %11 = sbr.rel (!%p9_p5) target bundleno = 2 (0x2), region = 61 }

// kernel: channel_attention.4
= control target key start
LH: loop header
LB: loop body
LE: loop exit
PB: predicated region body
PF: predicated region fallthrough
CT: control target
= control target key end

     0   :  { %vm20_vm0 = vcmask 1043456   ;;  %vm16_vm1 = vcmask 31744   ;;  %v215_v0 = vmov 0.0   ;;  %vm216_vm2 = vmmov 0   ;;  %s249_s1 = inlined_call_operand.vmem [shape: f32[4,1], index: 1, kind: input, shape index: {}]   ;;  %s250_s0 = inlined_call_operand.vmem [shape: f32[4,4], index: 0, kind: input, shape index: {}]   ;;  %s251_s2 = inlined_call_operand.vmem [shape: f32[1,4], index: 2, kind: input, shape index: {}]   ;;  %s252_s3 = inlined_call_operand.vmem [shape: f32[2,4], index: 3, kind: output, shape index: {}]  }
   0x1   :  { %199 = vmatprep.subr.mxu0 %v215_v0  ;;  %v15_v1 = vld [vmem:[%s249_s1] sm:$0xf]  ;;  %201 = vmatprep.mubr.msk.f32.mxu0 %vm216_vm2, %v215_v0  ;;  %vm100_vm3 = vcmask 1040384   ;;  %vm96_vm4 = vcmask 7168   ;;  %vm184_vm5 = vcmask 25600  }
   0x2   :  { %v14_v2 = vld [vmem:[%s250_s0] sm:$0xf]  ;;  %200 = vmatpush3.msk.msra.mxu0 %vm20_vm0, %v15_v1  ;;  %204 = vmatprep.subr.mxu1 %v215_v0 }
   0x3   :  { %202 = vmatmul.mubr.msk.f32.vlgmr.msra.gmra.mrb[0].mxu0 %vm16_vm1, %v14_v2  ;;  %206 = vmatprep.mubr.msk.f32.mxu1 %vm216_vm2, %v215_v0  ;;  %v95_v3 = vld [vmem:[%s251_s2] sm:$0x1] }
   0x4   :  { %205 = vmatpush3.msk.msra.mxu1 %vm100_vm3, %v95_v3 }
  0xd6   :  { %v90_v4 = vpop.f32.mrb[0].mxu0 }
  0xd7   :  { %v94_v5 = vmax.f32 %v90_v4, 0.0  ;;  %v203_v6 = vpop.f32.mrb[1].mxu0 }
  0xd9   :  { %207 = vmatmul.mubr.msk.f32.vlgmr.msra.gmra.mrb[0].mxu1 %vm96_vm4, %v94_v5 }
 0x1ac   :  { %v170_v7 = vpop.f32.mrb[0].mxu1 }
 0x1ad   :  { %v175_v8 = vrot.slane %v170_v7, 2  ;;  %v208_v9 = vpop.f32.mrb[1].mxu1 }
 0x1af   :  { %v177_v10 = vadd.f32 %v175_v8, %v170_v7 }
 0x1b1   :  { %v194_v11 = vmul.f32 -1.442695, %v177_v10 }
 0x1b3   :  { %211 = vpow2.f32 %v194_v11 }
 0x1bd   :  { %v212_v12 = vpop.eup %211 }
 0x1be   :  { %v181_v13 = vadd.f32 1.0, %v212_v12 }
 0x1c0   :  { %213 = vrcp.f32 %v181_v13 }
 0x1ca   :  { %v214_v14 = vpop.eup %213 }
 0x1cb   :  { %185 = vst.msk [vmem:[%s252_s3] sm:$0x3] %vm184_vm5, %v214_v14 }

</bundles_post_ra>
